<compile_context>
chip_gen: v5e
topology: v5e:2x2
jax: 0.10.0
libtpu: 0.0.40
codegen_flags: <defaults>
</compile_context>

<pallas_src>
import functools

import jax
import jax.numpy as jnp
import numpy as np
from jax.experimental import pallas as pl
from jax.experimental.pallas import tpu as pltpu


def _round_up(x, m):
    return ((x + m - 1) // m) * m


# --------------------------------------------------------------------------------------
# Pallas kernel: fused softmax + class-cost gather + L2 cdist + blend, one (batch, N-tile)
# block of the per-batch cost matrix per grid step.
# --------------------------------------------------------------------------------------
def _cost_kernel(logits_ref, pts_ref, onehot_ref, tgt_xy_ref, c_ref, *,
                 cost_class, cost_point, num_classes):
    # Stable softmax over classes. K is tiny (static), so this is negligible next to the
    # [tile_n, T_pad] work below; keeping it fused avoids an extra HBM round-trip of prob.
    logits = logits_ref[...]                                     # [tile_n, K] f32
    m = jnp.max(logits, axis=-1, keepdims=True)
    e = jnp.exp(logits - m)
    prob = e / jnp.sum(e, axis=-1, keepdims=True)                # [tile_n, K]

    onehot = onehot_ref[...]                                     # [K, T_pad]
    if num_classes >= 128:
        # large-K path: one-hot gather as an MXU matmul
        cls_cost = jnp.dot(prob, onehot, preferred_element_type=jnp.float32)
    else:
        # small-K path: VPU broadcast-sum; a [N,K]x[K,T] matmul with K=2 would use ~1-2%
        # of the systolic array and burn MXU push/pop latency for 2 FMAs per element.
        cls_cost = prob[:, 0:1] * onehot[0:1, :]                 # [tile_n, T_pad]
        for k in range(1, num_classes):
            cls_cost = cls_cost + prob[:, k:k + 1] * onehot[k:k + 1, :]

    # L2 cdist over the two coordinates (broadcast on the VPU, single sqrt on the EUP).
    dx = pts_ref[:, 0:1] - tgt_xy_ref[0:1, :]                    # [tile_n, T_pad]
    dy = pts_ref[:, 1:2] - tgt_xy_ref[1:2, :]
    dist = jnp.sqrt(dx * dx + dy * dy)

    # C = cost_point * cdist + cost_class * (-prob[:, tgt_ids])
    c_ref[...] = cost_point * dist - cost_class * cls_cost


def _choose_tiles(num_queries, num_classes, t_pad):
    """Pick an N-tile that is (8,)-aligned and keeps the double-buffered per-step VMEM
    footprint comfortably under the scoped default on all generations (incl. v7x 64 MiB)."""
    q_pad = _round_up(max(num_queries, 1), 8)
    tile_n = min(q_pad, 512)

    def step_bytes(tn):
        per_tile = tn * (num_classes + 2 + t_pad) * 4            # logits + pts + C rows
        shared = (num_classes + 2) * t_pad * 4                   # onehot + tgt_xy
        return 2 * (per_tile + shared)                           # double-buffered

    while tile_n > 8 and step_bytes(tile_n) > (16 << 20):
        tile_n //= 2
    tile_n = max(8, _round_up(tile_n, 8))
    q_pad = _round_up(q_pad, tile_n)
    return q_pad, tile_n


def _compute_cost_blocks(logits, pts, onehot, tgt_xy, cost_class, cost_point, tile_n):
    """logits [bs, Q_pad, K], pts [bs, Q_pad, 2], onehot [bs, K, T_pad], tgt_xy [bs, 2, T_pad]
    -> C [bs, Q_pad, T_pad] (per-batch cost blocks; padded rows/cols are discarded on host)."""
    bs, q_pad, num_classes = logits.shape
    t_pad = tgt_xy.shape[2]
    n_tiles = q_pad // tile_n

    kernel = functools.partial(_cost_kernel,
                               cost_class=float(cost_class),
                               cost_point=float(cost_point),
                               num_classes=int(num_classes))
    return pl.pallas_call(
        kernel,
        out_shape=jax.ShapeDtypeStruct((bs, q_pad, t_pad), jnp.float32),
        grid=(bs, n_tiles),
        in_specs=[
            pl.BlockSpec((None, tile_n, num_classes), lambda b, i: (b, i, 0)),
            pl.BlockSpec((None, tile_n, 2), lambda b, i: (b, i, 0)),
            pl.BlockSpec((None, num_classes, t_pad), lambda b, i: (b, 0, 0)),
            pl.BlockSpec((None, 2, t_pad), lambda b, i: (b, 0, 0)),
        ],
        out_specs=pl.BlockSpec((None, tile_n, t_pad), lambda b, i: (b, i, 0)),
        compiler_params=pltpu.CompilerParams(
            dimension_semantics=("parallel", "parallel")),
    )(logits, pts, onehot, tgt_xy)


# --------------------------------------------------------------------------------------
# Host-side Hungarian (rectangular linear sum assignment, shortest augmenting path O(n^3))
# TODO(synk): linear_sum_assignment is a sequential combinatorial algorithm; no Pallas equivalent.
# --------------------------------------------------------------------------------------
def _linear_sum_assignment(cost):
    cost = np.asarray(cost, dtype=np.float64)
    transposed = False
    if cost.shape[0] > cost.shape[1]:
        cost = cost.T
        transposed = True
    n, m = cost.shape
    INF = np.inf
    u = np.zeros(n + 1)
    v = np.zeros(m + 1)
    p = np.zeros(m + 1, dtype=np.int64)    # column -> assigned row (1-indexed), 0 = free
    way = np.zeros(m + 1, dtype=np.int64)
    for i in range(1, n + 1):
        p[0] = i
        j0 = 0
        minv = np.full(m + 1, INF)
        used = np.zeros(m + 1, dtype=bool)
        while True:
            used[j0] = True
            i0 = p[j0]
            delta = INF
            j1 = -1
            for j in range(1, m + 1):
                if not used[j]:
                    cur = cost[i0 - 1, j - 1] - u[i0] - v[j]
                    if cur < minv[j]:
                        minv[j] = cur
                        way[j] = j0
                    if minv[j] < delta:
                        delta = minv[j]
                        j1 = j
            for j in range(m + 1):
                if used[j]:
                    u[p[j]] += delta
                    v[j] -= delta
                else:
                    minv[j] -= delta
            j0 = j1
            if p[j0] == 0:
                break
        while True:
            j1 = way[j0]
            p[j0] = p[j1]
            j0 = j1
            if j0 == 0:
                break
    rows, cols = [], []
    for j in range(1, m + 1):
        if p[j] != 0:
            rows.append(p[j] - 1)
            cols.append(j - 1)
    rows = np.array(rows, dtype=np.int64)
    cols = np.array(cols, dtype=np.int64)
    if transposed:
        rows, cols = cols, rows
    order = np.argsort(rows)
    return rows[order], cols[order]


# --------------------------------------------------------------------------------------
# HungarianMatcher_Crowd forward
# --------------------------------------------------------------------------------------
def hungarian_matcher_crowd(outputs, targets, cost_class=1.0, cost_point=1.0):
    assert cost_class != 0 or cost_point != 0, "all costs cant be 0"
    pred_logits = outputs["pred_logits"]            # [bs, Q, K]
    pred_points = outputs["pred_points"]            # [bs, Q, 2]
    bs, num_queries, num_classes = pred_logits.shape

    sizes = [int(t["point"].shape[0]) for t in targets]
    t_max = max(sizes) if sizes else 0

    empty = (np.empty((0,), dtype=np.int64), np.empty((0,), dtype=np.int64))
    if t_max == 0:
        # no targets anywhere in the batch -> every match list is empty
        return [empty for _ in range(bs)]

    # Lane-dense target axis: pad max per-batch target count up to a multiple of 128.
    t_pad = _round_up(t_max, 128)
    q_pad, tile_n = _choose_tiles(num_queries, num_classes, t_pad)

    # -------- glue (host): per-batch padded one-hot of target ids and target xy ----------
    onehot = np.zeros((bs, num_classes, t_pad), dtype=np.float32)
    tgt_xy = np.zeros((bs, 2, t_pad), dtype=np.float32)
    for b, t in enumerate(targets):
        tb = sizes[b]
        if tb == 0:
            continue
        lab = np.asarray(t["labels"]).astype(np.int64).reshape(-1)
        pt = np.asarray(t["point"]).astype(np.float32).reshape(tb, 2)
        cols = np.arange(tb)
        valid = (lab >= 0) & (lab < num_classes)      # out-of-range ids -> zero prob (as one_hot)
        onehot[b, np.clip(lab, 0, num_classes - 1), cols] = valid.astype(np.float32)
        tgt_xy[b, :, :tb] = pt.T

    # -------- glue (device): pad queries to the tile size ----------
    logits = jnp.asarray(pred_logits, dtype=jnp.float32)
    pts = jnp.asarray(pred_points, dtype=jnp.float32)
    if q_pad != num_queries:
        logits = jnp.pad(logits, ((0, 0), (0, q_pad - num_queries), (0, 0)))
        pts = jnp.pad(pts, ((0, 0), (0, q_pad - num_queries), (0, 0)))

    # -------- hot path: per-batch fused cost blocks in Pallas ----------
    C = _compute_cost_blocks(logits, pts, jnp.asarray(onehot), jnp.asarray(tgt_xy),
                             cost_class, cost_point, tile_n)
    C = np.asarray(jax.block_until_ready(C))          # [bs, q_pad, t_pad]

    # -------- per-batch assignment on the valid [Q, T_b] sub-block ----------
    indices = []
    for b in range(bs):
        tb = sizes[b]
        if tb == 0:
            indices.append(empty)
            continue
        sub = C[b, :num_queries, :tb]
        i, j = _linear_sum_assignment(sub)
        indices.append((i.astype(np.int64), j.astype(np.int64)))
    return indices


if __name__ == "__main__":
    key = jax.random.PRNGKey(0)
    bs, num_queries, num_classes = 2, 16, 2
    k1, k2, k3, k4 = jax.random.split(key, 4)

    outputs = {
        "pred_logits": jax.random.normal(k1, (bs, num_queries, num_classes), dtype=jnp.float32),
        "pred_points": jax.random.uniform(k2, (bs, num_queries, 2), dtype=jnp.float32),
    }
    sizes = [5, 7]
    targets = [
        {
            "labels": jnp.ones((sizes[0],), dtype=jnp.int32),
            "point": jax.random.uniform(k3, (sizes[0], 2), dtype=jnp.float32),
        },
        {
            "labels": jnp.ones((sizes[1],), dtype=jnp.int32),
            "point": jax.random.uniform(k4, (sizes[1], 2), dtype=jnp.float32),
        },
    ]

    indices = hungarian_matcher_crowd(outputs, targets, cost_class=1.0, cost_point=1.0)

    # sanity: correct number of matches and valid index ranges per batch element
    for b, (i, j) in enumerate(indices):
        n_match = min(num_queries, sizes[b])
        assert i.shape[0] == n_match and j.shape[0] == n_match
        assert int(np.max(i)) < num_queries and int(np.max(j)) < sizes[b]
        assert len(np.unique(i)) == n_match and len(np.unique(j)) == n_match

    print("KERNEL_OK")
</pallas_src>

<mosaic_0001>
module attributes {stable_mosaic.version = 11 : i64} {
  func.func @_cost_kernel(%arg0: i32, %arg1: i32, %arg2: memref<1x16x2xf32, #tpu.memory_space<vmem>>, %arg3: memref<1x16x2xf32, #tpu.memory_space<vmem>>, %arg4: memref<1x2x128xf32, #tpu.memory_space<vmem>>, %arg5: memref<1x2x128xf32, #tpu.memory_space<vmem>>, %arg6: memref<1x16x128xf32, #tpu.memory_space<vmem>>) attributes {dimension_semantics = [#tpu.dimension_semantics<parallel>, #tpu.dimension_semantics<parallel>], iteration_bounds = array<i64: 2, 1>, scalar_prefetch = 0 : i64, scratch_operands = 0 : i64, tpu.core_type = #tpu.core_type<tc>, window_params = [{transform_indices = @transform_0, window_bounds = array<i64: 1, 16, 2>}, {transform_indices = @transform_1, window_bounds = array<i64: 1, 16, 2>}, {transform_indices = @transform_2, window_bounds = array<i64: 1, 2, 128>}, {transform_indices = @transform_3, window_bounds = array<i64: 1, 2, 128>}, {transform_indices = @transform_4, window_bounds = array<i64: 1, 16, 128>}]} {
    %c0 = arith.constant 0 : index
    %c0_0 = arith.constant 0 : index
    %c0_1 = arith.constant 0 : index
    %0 = vector.load %arg2[%c0, %c0_0, %c0_1] : memref<1x16x2xf32, #tpu.memory_space<vmem>>, vector<1x16x2xf32>
    %1 = vector.shape_cast %0 : vector<1x16x2xf32> to vector<16x2xf32>
    %cst = arith.constant dense<0xFF800000> : vector<16xf32>
    %2 = vector.multi_reduction <maximumf>, %1, %cst [1] : vector<16x2xf32> to vector<16xf32>
    %3 = vector.shape_cast %2 : vector<16xf32> to vector<16x1xf32>
    %4 = vector.broadcast %3 : vector<16x1xf32> to vector<16x2xf32>
    %5 = arith.subf %1, %4 : vector<16x2xf32>
    %6 = math.exp %5 : vector<16x2xf32>
    %cst_2 = arith.constant dense<0.000000e+00> : vector<16xf32>
    %7 = vector.multi_reduction <add>, %6, %cst_2 [1] : vector<16x2xf32> to vector<16xf32>
    %8 = vector.shape_cast %7 : vector<16xf32> to vector<16x1xf32>
    %9 = vector.broadcast %8 : vector<16x1xf32> to vector<16x2xf32>
    %10 = arith.divf %6, %9 : vector<16x2xf32>
    %c0_3 = arith.constant 0 : index
    %c0_4 = arith.constant 0 : index
    %c0_5 = arith.constant 0 : index
    %11 = vector.load %arg4[%c0_3, %c0_4, %c0_5] : memref<1x2x128xf32, #tpu.memory_space<vmem>>, vector<1x2x128xf32>
    %12 = vector.shape_cast %11 : vector<1x2x128xf32> to vector<2x128xf32>
    %13 = vector.extract_strided_slice %10 {offsets = [0, 0], sizes = [16, 1], strides = [1, 1]} : vector<16x2xf32> to vector<16x1xf32>
    %14 = vector.extract_strided_slice %12 {offsets = [0, 0], sizes = [1, 128], strides = [1, 1]} : vector<2x128xf32> to vector<1x128xf32>
    %15 = vector.broadcast %13 : vector<16x1xf32> to vector<16x128xf32>
    %16 = vector.broadcast %14 : vector<1x128xf32> to vector<16x128xf32>
    %17 = arith.mulf %15, %16 : vector<16x128xf32>
    %18 = vector.extract_strided_slice %10 {offsets = [0, 1], sizes = [16, 1], strides = [1, 1]} : vector<16x2xf32> to vector<16x1xf32>
    %19 = vector.extract_strided_slice %12 {offsets = [1, 0], sizes = [1, 128], strides = [1, 1]} : vector<2x128xf32> to vector<1x128xf32>
    %20 = vector.broadcast %18 : vector<16x1xf32> to vector<16x128xf32>
    %21 = vector.broadcast %19 : vector<1x128xf32> to vector<16x128xf32>
    %22 = arith.mulf %20, %21 : vector<16x128xf32>
    %23 = arith.addf %17, %22 : vector<16x128xf32>
    %c0_6 = arith.constant 0 : index
    %c0_7 = arith.constant 0 : index
    %c0_8 = arith.constant 0 : index
    %24 = vector.load %arg3[%c0_6, %c0_7, %c0_8] : memref<1x16x2xf32, #tpu.memory_space<vmem>>, vector<1x16x1xf32>
    %25 = vector.shape_cast %24 : vector<1x16x1xf32> to vector<16x1xf32>
    %c0_9 = arith.constant 0 : index
    %c0_10 = arith.constant 0 : index
    %c0_11 = arith.constant 0 : index
    %26 = vector.load %arg5[%c0_9, %c0_10, %c0_11] : memref<1x2x128xf32, #tpu.memory_space<vmem>>, vector<1x1x128xf32>
    %27 = vector.shape_cast %26 : vector<1x1x128xf32> to vector<1x128xf32>
    %28 = vector.broadcast %25 : vector<16x1xf32> to vector<16x128xf32>
    %29 = vector.broadcast %27 : vector<1x128xf32> to vector<16x128xf32>
    %30 = arith.subf %28, %29 : vector<16x128xf32>
    %c0_12 = arith.constant 0 : index
    %c0_13 = arith.constant 0 : index
    %c1 = arith.constant 1 : index
    %31 = vector.load %arg3[%c0_12, %c0_13, %c1] : memref<1x16x2xf32, #tpu.memory_space<vmem>>, vector<1x16x1xf32>
    %32 = vector.shape_cast %31 : vector<1x16x1xf32> to vector<16x1xf32>
    %c0_14 = arith.constant 0 : index
    %c1_15 = arith.constant 1 : index
    %c0_16 = arith.constant 0 : index
    %33 = vector.load %arg5[%c0_14, %c1_15, %c0_16] : memref<1x2x128xf32, #tpu.memory_space<vmem>>, vector<1x1x128xf32>
    %34 = vector.shape_cast %33 : vector<1x1x128xf32> to vector<1x128xf32>
    %35 = vector.broadcast %32 : vector<16x1xf32> to vector<16x128xf32>
    %36 = vector.broadcast %34 : vector<1x128xf32> to vector<16x128xf32>
    %37 = arith.subf %35, %36 : vector<16x128xf32>
    %38 = arith.mulf %30, %30 : vector<16x128xf32>
    %39 = arith.mulf %37, %37 : vector<16x128xf32>
    %40 = arith.addf %38, %39 : vector<16x128xf32>
    %41 = math.sqrt %40 : vector<16x128xf32>
    %cst_17 = arith.constant 1.000000e+00 : f32
    %42 = vector.broadcast %cst_17 : f32 to vector<16x128xf32>
    %43 = arith.mulf %42, %41 : vector<16x128xf32>
    %cst_18 = arith.constant 1.000000e+00 : f32
    %44 = vector.broadcast %cst_18 : f32 to vector<16x128xf32>
    %45 = arith.mulf %44, %23 : vector<16x128xf32>
    %46 = arith.subf %43, %45 : vector<16x128xf32>
    %c0_19 = arith.constant 0 : index
    %c0_20 = arith.constant 0 : index
    %c0_21 = arith.constant 0 : index
    %47 = vector.load %arg6[%c0_19, %c0_20, %c0_21] : memref<1x16x128xf32, #tpu.memory_space<vmem>>, vector<1x16x128xf32>
    %48 = vector.shape_cast %47 : vector<1x16x128xf32> to vector<16x128xf32>
    %49 = vector.shape_cast %46 : vector<16x128xf32> to vector<1x16x128xf32>
    tpu.vector_store %arg6[%c0_19, %c0_20, %c0_21], %49 {strides = array<i32>} : memref<1x16x128xf32, #tpu.memory_space<vmem>>, vector<1x16x128xf32>,
    return
  }
  func.func @transform_0(%arg0: i32, %arg1: i32) -> (i32, i32, i32) {
    %c0_i32 = arith.constant 0 : i32
    %c0_i32_0 = arith.constant 0 : i32
    return %arg0, %arg1, %c0_i32 : i32, i32, i32
  }
  func.func @transform_1(%arg0: i32, %arg1: i32) -> (i32, i32, i32) {
    %c0_i32 = arith.constant 0 : i32
    %c0_i32_0 = arith.constant 0 : i32
    return %arg0, %arg1, %c0_i32 : i32, i32, i32
  }
  func.func @transform_2(%arg0: i32, %arg1: i32) -> (i32, i32, i32) {
    %c0_i32 = arith.constant 0 : i32
    %c0_i32_0 = arith.constant 0 : i32
    %c0_i32_1 = arith.constant 0 : i32
    return %arg0, %c0_i32, %c0_i32_0 : i32, i32, i32
  }
  func.func @transform_3(%arg0: i32, %arg1: i32) -> (i32, i32, i32) {
    %c0_i32 = arith.constant 0 : i32
    %c0_i32_0 = arith.constant 0 : i32
    %c0_i32_1 = arith.constant 0 : i32
    return %arg0, %c0_i32, %c0_i32_0 : i32, i32, i32
  }
  func.func @transform_4(%arg0: i32, %arg1: i32) -> (i32, i32, i32) {
    %c0_i32 = arith.constant 0 : i32
    %c0_i32_0 = arith.constant 0 : i32
    return %arg0, %arg1, %c0_i32 : i32, i32, i32
  }
}

</mosaic_0001>

<bundles_post_ra>
// kernel: tpu_custom_call.1
= control target key start
LH: loop header
LB: loop body
LE: loop exit
PB: predicated region body
PF: predicated region fallthrough
CT: control target
= control target key end

     0   :  { %9 = vsyncpa [#allocation3], 0  ;;  %s908_s0 = inlined_call_operand.vmem [shape: f32[2,16,2], index: 0, kind: input, shape index: {}]   ;;  %s909_s1 = inlined_call_operand.vmem [shape: f32[2,16,2], index: 1, kind: input, shape index: {}]   ;;  %s910_s2 = inlined_call_operand.vmem [shape: f32[2,2,128], index: 2, kind: input, shape index: {}]   ;;  %s911_s3 = inlined_call_operand.vmem [shape: f32[2,2,128], index: 3, kind: input, shape index: {}]   ;;  %s912_s4 = inlined_call_operand.hbm [shape: f32[2,16,128], index: 4, kind: output, shape index: {}]  }
   0x1   :  { %11 = vsyncpa [#allocation3 + $0x1], 0  ;;  %s782_s15 = smov 0   ;;  %s784_s16 = smov 0  }
   0x2   :  { %s786_s17 = smov 0   ;;  %s788_s18 = smov 0  }
   0x3   :  { %s790_s19 = smov 0   ;;  %s792_s20 = smov 0  }
   0x4 LB: > { %s576_s21 = sadd.s32 4294967295, %s751_s20   ;;  %s577_s22 = sadd.s32 4294967294, %s751_s20   ;;  %s751_s20 = sphi %s792_s20, %s17_s20   ;;  %s747_s19 = sphi %s790_s19, %s919_s19   ;;  %s743_s18 = sphi %s788_s18, %s918_s18   ;;  %s739_s17 = sphi %s786_s17, %s917_s17   ;;  %s735_s16 = sphi %s784_s16, %s916_s16   ;;  %s731_s15 = sphi %s782_s15, %s915_s15  }
   0x5   : > { %s29_s23 = sadd.s32 1, %s747_s19  ;;  %s146_s24 = sadd.s32 1, %s739_s17 }
   0x6   : > { %p31_p0 = scmp.ge.s32.totalorder %s29_s23, 2  ;;  %p156_p1 = scmp.ne.s32.totalorder %s739_s17, %s735_s16 }
   0x7   : > { %p157_p2 = scmp.eq.s32.totalorder %s576_s21, 1  ;;  %p162_p3 = scmp.ne.s32.totalorder %s735_s16, %s731_s15 }
   0x8   : > { %s921_s23 = smov (%p31_p0, %s29_s23), 0  ;;  %p163_p5 = scmp.eq.s32.totalorder %s577_s22, 1 }
   0x9   : > { %p822_p4 = por %p157_p2, %p156_p1  ;;  %s141_s26 = ssub.s32 %s747_s19, %s921_s23 }
   0xa   : > { %p580_p6 = scmp.ge.s32.totalorder %s751_s20, 1  ;;  %p144_p7 = scmp.eq.s32.totalorder %s141_s26, 0 }
   0xb   : > { %p829_p8 = por %p163_p5, %p162_p3  ;;  %p221_p9 = scmp.lt.s32.totalorder %s751_s20, 3 }
   0xc   : > { %s835_s28 = scalar_select %p144_p7, %s739_s17, %s146_s24  }
   0xd   : > { %p222_p10 = pnand %p580_p6, %p221_p9 }
   0xe   : > { %p269_p11 = scmp.lt.s32.totalorder (!%p222_p10), %s743_s18, 1  ;;  %s265_s26 = sand.u32 (!%p222_p10), 1, %s735_s16  }
   0xf   : > { %225 = sbr.rel (%p222_p10) target bundleno = 415 (0x19f), region = 36  ;;  %s693_s21 = scalar_lea.hbm (!%p222_p10), %s912_s4, 32 }
  0x14   : > { %s839_s29 = scalar_select %p269_p11, %s743_s18, 1  ;;  %vm299_vm0 = vcmask 15360   ;;  %v753_v5 = vmov 1   ;;  %v754_v14 = vmov 0  }
  0x15   : > { %657 = vset.pattern.permute.xlu1 %v753_v5  ;;  %656 = vset.pattern.permute.xlu0 %v753_v5 }
  0x16   : > { %s593_s30 = sshll.u32 %s839_s29, 4  ;;  %655 = vset.pattern.permute.xlu2 %v754_v14  ;;  %s586_s11 = sshll.u32 %s839_s29, 1 }
  0x17   : > { %s276_s7 = scalar_lea.vmem %s908_s0, %s593_s30  ;;  %s286_s10 = scalar_lea.vmem %s909_s1, %s593_s30 }
  0x18   : > { %v297_v0 = vld [vmem:[%s276_s7] sm:$0xff]  ;;  %v298_v2 = vld [vmem:[%s276_s7 + $0x8] sm:$0xff]  ;;  %s858_s14 = scalar_lea.vmem %s911_s3, %s586_s11  ;;  %s291_s24 = scalar_lea.vmem %s910_s2, %s586_s11 }
  0x19   : > { %v300_v1 = vsel %vm299_vm0, %v297_v0, -inf  ;;  %v303_v3 = vsel %vm299_vm0, %v298_v2, -inf  ;;  %v375_v4 = vld [vmem:[%s286_s10] sm:$0xff]  ;;  %v376_v17 = vld [vmem:[%s286_s10 + $0x8] sm:$0xff]  ;;  %s581_s29 = sshll.u32 %s265_s26, 4  ;;  %s595_s30 = sshll.u32 %s743_s18, 4 }
  0x1a   : > { %301 = vmax.xlane.f32.xlu0 %v300_v1  ;;  %380 = vperm.xlu2 %655, %v375_v4   ;;  %v659_v43 = vld [vmem:[%s858_s14] ss:$0 sm:$0xff]  ;;  %v660_v44 = vld [vmem:[%s858_s14 + $0x1] ss:$0 sm:$0xff]  ;;  %s267_s5 = scalar_lea.vmem [#allocation2], %s581_s29  ;;  %s451_s8 = scalar_lea.hbm %s912_s4, %s595_s30 }
  0x1b   : > { %s452_s9 = sshll.u32 %s267_s5, 4  ;;  %s454_s10 = sshll.u32 %s451_s8, 4  ;;  %s453_s9 = int_to_ptr.vmem [resolvable:$true] %s452_s9  ;;  %s455_s10 = int_to_ptr.hbm [resolvable:$true] %s454_s10 }
  0x1c   : > { %s438_s18 = scalar_lea.sflag [#allocation3], %s265_s26  ;;  %s687_s11 = sshra.s32 %s455_s10, 4  ;;  %s688_s11 = int_to_ptr.hbm [resolvable:$true] %s687_s11 }
  0x1d   : > { %s689_s12 = scalar_lea.hbm %s688_s11, 16  ;;  %p694_p1 = scmp.lt.s32.totalorder %s688_s11, %s912_s4 }
  0x1e   : > { %p690_p12 = scmp.ne.s32.totalorder %s688_s11, %s689_s12  ;;  %p695_p2 = scmp.lt.s32.totalorder %s693_s21, %s689_s12 }
  0x20   : > { %p691_p13 = pnand %p690_p12, %p822_p4  ;;  %p696_p3 = por %p695_p2, %p694_p1 }
  0x22   : > { %304 = vmax.xlane.f32.xlu0 %v303_v3  ;;  %385 = vperm.xlu2 %655, %v376_v17   ;;  %p692_p0 = pneg %p691_p13 }
  0x24   : > { %p697_p5 = pnand %p696_p3, %p692_p0 }
  0x36   : > { %393 = vperm.xlu0 %656, %v375_v4  }
  0x74   : > { %v381_v42 = vpop.permute.xlu2 %380 }
  0x75   : > { %v389_v46 = vsub.f32 %v381_v42, %v659_v43 }
  0x77   : > { %v403_v48 = vmul.f32 %v389_v46, %v389_v46 }
  0x7c   : > { %v386_v49 = vpop.permute.xlu2 %385 }
  0x7d   : > { %v390_v52 = vsub.f32 %v386_v49, %v659_v43 }
  0x7f   : > { %v404_v55 = vmul.f32 %v390_v52, %v390_v52 }
  0x8d   : > { %v302_v6 = vpop.xlane.xlu0 %301 }
  0x8e   : > { %v306_v7 = vsub.f32 %v297_v0, %v302_v6  ;;  %v348_v6 = vld [vmem:[%s291_s24] sm:$0x3] }
  0x90   : > { %v308_v8 = vmul.f32 1.442695, %v306_v7 }
  0x92   : > { %661 = vpow2.f32 %v308_v8  ;;  %v359_v8 = vperm.slane %v348_v6, 0 }
  0x95   : > { %v305_v9 = vpop.xlane.xlu0 %304 }
  0x96   : > { %v307_v10 = vsub.f32 %v298_v2, %v305_v9  ;;  %v370_v9 = vperm.slane %v348_v6, 1 }
  0x98   : > { %v662_v11 = vpop.eup %661  ;;  %v310_v12 = vmul.f32 1.442695, %v307_v10 }
  0x99   : > { %v312_v13 = vsel %vm299_vm0, %v662_v11, 0.0 }
  0x9a   : > { %663 = vpow2.f32 %v310_v12  ;;  %313 = vadd.xlane.f32.xlu1 %v312_v13 }
  0xa0   : > { %v664_v15 = vpop.eup %663 }
  0xa1   : > { %v315_v16 = vsel %vm299_vm0, %v664_v15, 0.0 }
  0xa2   : > { %316 = vadd.xlane.f32.xlu1 %v315_v16 }
  0xa8   : > { %v394_v45 = vpop.permute.xlu0 %393 }
  0xa9   : > { %v401_v47 = vsub.f32 %v394_v45, %v660_v44 }
  0xab   : > { %v405_v51 = vmul.f32 %v401_v47, %v401_v47 }
  0xad   : > { %v407_v54 = vadd.f32 %v405_v51, %v403_v48 }
  0xaf   : > { %vm416_vm9 = vcmp.eq.f32.partialorder %v407_v54, inf  ;;  %v419_v12 = vand.u32 2147483648, %v407_v54  ;;  %vm418_vm10 = vcmp.eq.f32.partialorder %v407_v54, 0.0 }
  0xbb   : > { %397 = vperm.xlu1 %657, %v376_v17  }
 0x10d   : > { %v314_v18 = vpop.xlane.xlu1 %313 }
 0x10e   : > { %665 = vrcp.f32 %v314_v18  ;;  %v329_v23 = vand.u32 2147483648, %v314_v18  ;;  %v327_v25 = vand.u32 2147483647, %v314_v18  ;;  %vm323_vm2 = vweird.f32 %v314_v18 }
 0x110   : > { %v330_v28 = vor.u32 1.1754944e-38, %v329_v23  ;;  %vm328_vm4 = vcmp.eq.f32.partialorder %v327_v25, 8.507059e+37 }
 0x114   : > { %v666_v19 = vpop.eup %665 }
 0x115   : > { %v319_v20 = vmul.f32 %v666_v19, %v314_v18  ;;  %v317_v21 = vpop.xlane.xlu1 %316  ;;  %vm324_vm1 = vweird.f32 %v666_v19 }
 0x116   : > { %667 = vrcp.f32 %v317_v21  ;;  %vm325_vm3 = vmor %vm323_vm2, %vm324_vm1  ;;  %v344_v34 = vand.u32 2147483648, %v317_v21  ;;  %v342_v36 = vand.u32 2147483647, %v317_v21  ;;  %vm338_vm6 = vweird.f32 %v317_v21 }
 0x117   : > { %v320_v22 = vsub.f32 1.0, %v319_v20  ;;  %669 = vrsqrt.f32 %v407_v54 }
 0x118   : > { %v345_v38 = vor.u32 1.1754944e-38, %v344_v34  ;;  %vm343_vm8 = vcmp.eq.f32.partialorder %v342_v36, 8.507059e+37 }
 0x119   : > { %v321_v24 = vmul.f32 %v666_v19, %v320_v22 }
 0x11b   : > { %v322_v26 = vadd.f32 %v666_v19, %v321_v24 }
 0x11c   : > { %v668_v27 = vpop.eup %667 }
 0x11d   : > { %v334_v29 = vmul.f32 %v668_v27, %v317_v21  ;;  %v326_v30 = vsel %vm325_vm3, %v666_v19, %v322_v26  ;;  %vm339_vm5 = vweird.f32 %v668_v27  ;;  %v670_v58 = vpop.eup %669 }
 0x11e   : > { %v331_v31 = vsel %vm328_vm4, %v330_v28, %v326_v30  ;;  %vm340_vm7 = vmor %vm338_vm6, %vm339_vm5  ;;  %v410_v59 = vmul.f32 %v670_v58, %v407_v54 }
 0x11f   : > { %v335_v32 = vsub.f32 1.0, %v334_v29  ;;  %v332_v33 = vmul.f32 %v662_v11, %v331_v31 }
 0x120   : > { %v411_v61 = vmul.f32 %v670_v58, %v410_v59 }
 0x121   : > { %v336_v35 = vmul.f32 %v668_v27, %v335_v32  ;;  %351 = vperm.xlu2 %655, %v332_v33  }
 0x122   : > { %v412_v0 = vmul.f32 0.5, %v411_v61 }
 0x123   : > { %v337_v37 = vadd.f32 %v668_v27, %v336_v35 }
 0x124   : > { %v413_v2 = vsub.f32 1.5, %v412_v0 }
 0x125   : > { %v341_v39 = vsel %vm340_vm7, %v668_v27, %v337_v37 }
 0x126   : > { %v346_v40 = vsel %vm343_vm8, %v345_v38, %v341_v39 }
 0x127   : > { %v347_v41 = vmul.f32 %v664_v15, %v346_v40 }
 0x129   : > { %356 = vperm.xlu2 %655, %v347_v41  }
 0x12d   : > { %v398_v50 = vpop.permute.xlu1 %397 }
 0x12e   : > { %v402_v53 = vsub.f32 %v398_v50, %v660_v44 }
 0x130   : > { %v406_v56 = vmul.f32 %v402_v53, %v402_v53 }
 0x131   : > { %658 = vset.pattern.permute.xlu2 %v753_v5  ;;  %v414_v5 = vmul.f32 %v670_v58, %v413_v2 }
 0x132   : > { %363 = vperm.xlu2 %658, %v332_v33   ;;  %v408_v57 = vadd.f32 %v406_v56, %v404_v55 }
 0x133   : > { %v415_v10 = vmul.f32 %v414_v5, %v407_v54 }
 0x134   : > { %671 = vrsqrt.f32 %v408_v57  ;;  %vm428_vm11 = vcmp.eq.f32.partialorder %v408_v57, inf  ;;  %v431_v22 = vand.u32 2147483648, %v408_v57  ;;  %vm430_vm12 = vcmp.eq.f32.partialorder %v408_v57, 0.0 }
 0x135   : > { %v417_v16 = vsel %vm416_vm9, %v407_v54, %v415_v10 }
 0x136   : > { %v420_v18 = vsel %vm418_vm10, %v419_v12, %v417_v16 }
 0x13a   : > { %367 = vperm.xlu2 %658, %v347_v41   ;;  %v672_v60 = vpop.eup %671 }
 0x13b   : > { %v422_v63 = vmul.f32 %v672_v60, %v408_v57 }
 0x13d   : > { %v423_v1 = vmul.f32 %v672_v60, %v422_v63 }
 0x13f   : > { %v424_v4 = vmul.f32 0.5, %v423_v1 }
 0x141   : > { %v425_v7 = vsub.f32 1.5, %v424_v4 }
 0x143   : > { %v426_v13 = vmul.f32 %v672_v60, %v425_v7 }
 0x145   : > { %v427_v20 = vmul.f32 %v426_v13, %v408_v57 }
 0x147   : > { %v429_v25 = vsel %vm428_vm11, %v408_v57, %v427_v20 }
 0x148   : > { %v432_v27 = vsel %vm430_vm12, %v431_v22, %v429_v25 }
 0x17b   : > { %v352_v62 = vpop.permute.xlu2 %351 }
 0x17c   : > { %v360_v14 = vmul.f32 %v359_v8, %v352_v62 }
 0x183   : > { %v357_v3 = vpop.permute.xlu2 %356 }
 0x184   : > { %v361_v23 = vmul.f32 %v359_v8, %v357_v3 }
 0x18c   : > { %v364_v11 = vpop.permute.xlu2 %363 }
 0x18d   : > { %v371_v15 = vmul.f32 %v370_v9, %v364_v11 }
 0x18f   : > { %v373_v17 = vadd.f32 %v371_v15, %v360_v14 }
 0x191   : > { %v433_v19 = vsub.f32 %v420_v18, %v373_v17 }
 0x193   : > { %435 = vst [vmem:[%s267_s5] sm:$0xff] %v433_v19 }
 0x194   : > { %v368_v21 = vpop.permute.xlu2 %367 }
 0x195   : > { %v372_v24 = vmul.f32 %v370_v9, %v368_v21 }
 0x197   : > { %v374_v26 = vadd.f32 %v372_v24, %v361_v23 }
 0x199   : > { %v434_v28 = vsub.f32 %v432_v27, %v374_v26 }
 0x19b   : > { %436 = vst [vmem:[%s267_s5 + $0x8] sm:$0xff] %v434_v28 }
 0x19c   : > { %700 = shalt.err (!%p697_p5)
}
 0x19d   : > { %s755_s26 = smov 128   ;;  %s756_s29 = smov 8  }
 0x19e   : > { %596 = dma.vmem_to_hbm [thread:$0]  (%p822_p4), %s453_s9, 256, %s455_s10, %s438_s18, %s755_s26, %s755_s26, %s756_s29  }
 0x19f PF: > { %p602_p6 = scmp.ge.s32.totalorder %s751_s20, 2  ;;  %s469_s30 = sand.u32 1, %s731_s15  }
 0x1a0   : > { %s470_s5 = scalar_lea.sflag [#allocation3], %s469_s30 }
 0x1a1   : > { %p599_p7 = pnand %p602_p6, %p829_p8 }
 0x1a3   : > { %p600_p9 = pneg %p599_p7 }
 0x1a5   : > { %726 = dma.done.wait (%p600_p9), %s470_s5, 256  }
 0x1a6   : > { %728 = vsyncadd (%p600_p9), %s470_s5, 4294967040  ;;  %s17_s20 = sadd.s32 1, %s751_s20   ;;  %s915_s15 = smov %s735_s16 }
 0x1a7   : > { %p14_p10 = scmp.ge.s32.totalorder %s17_s20, 4   ;;  %s916_s16 = smov %s739_s17 }
 0x1a8   : > { %s917_s17 = smov %s835_s28  ;;  %s918_s18 = smov %s747_s19 }
 0x1a9   : > { %s919_s19 = smov %s921_s23  ;;  %16 = sbr.rel (!%p14_p10) target bundleno = 4 (0x4), region = 80 }
 0x1ae   :  { %476 = vsyncpa [#allocation3], 1 }
 0x1af   :  { %478 = vsyncpa [#allocation3 + $0x1], 1 }

</bundles_post_ra>
